<compile_context>
chip_gen: v7x
topology: tpu7x:2x2x1
jax: 0.10.0
libtpu: 0.0.40
codegen_flags: <defaults>
</compile_context>

<pallas_src>
import functools

import jax
import jax.numpy as jnp
from jax.experimental import pallas as pl
from jax.experimental.pallas import tpu as pltpu


LANE = 128                     # output/class dim is padded to a multiple of this
COMPUTE_DTYPE = jnp.bfloat16   # MXU operand dtype; accumulation stays f32


def _round_up(x, m):
    return ((x + m - 1) // m) * m


def classifier_kernel(x_ref, w1_ref, b1_ref, w2_ref, b2_ref, o_ref):
    # x_ref : (TB, H)   pooled embeddings tile, bf16
    # w1_ref: (H, H)    linear1 weight [in, out], bf16 (resident across grid)
    # b1_ref: (1, H)    linear1 bias, f32
    # w2_ref: (H, Cp)   linear2 weight [in, out padded to 128 lanes], bf16
    # b2_ref: (1, Cp)   linear2 bias (zero padded), f32
    # o_ref : (TB, Cp)  logits tile (lane-dense), f32
    h = jnp.dot(x_ref[...], w1_ref[...], preferred_element_type=jnp.float32)
    h = jnp.maximum(h + b1_ref[...], 0.0)                       # bias + ReLU in f32
    logits = jnp.dot(h.astype(w2_ref.dtype), w2_ref[...],
                     preferred_element_type=jnp.float32) + b2_ref[...]
    o_ref[...] = logits.astype(o_ref.dtype)


def prepare_params(w1, b1, w2, b2):
    """One-time parameter prep (do this at load time, NOT per forward call):
    transpose to [in, out], cast weights to bf16, pad class dim to 128 lanes."""
    H = w1.shape[1]
    C = w2.shape[0]
    c_pad = _round_up(C, LANE)
    w1_t = w1.T.astype(COMPUTE_DTYPE)                                      # (H, H)
    w2_t = jnp.zeros((H, c_pad), COMPUTE_DTYPE).at[:, :C].set(
        w2.T.astype(COMPUTE_DTYPE))                                        # (H, Cp)
    b1_2d = b1.reshape(1, H).astype(jnp.float32)                           # (1, H)
    b2_2d = jnp.zeros((1, c_pad), jnp.float32).at[:, :C].set(
        b2.astype(jnp.float32))                                            # (1, Cp)
    return w1_t, b1_2d, w2_t, b2_2d


@functools.partial(jax.jit, static_argnames=("num_classes", "tile_b"))
def classifier_forward(pooled, w1_t, b1_2d, w2_t, b2_2d, *, num_classes,
                       tile_b=None):
    """pooled: [B, H] f32; prepped params from prepare_params(); returns [B, C] f32."""
    B, H = pooled.shape
    c_pad = w2_t.shape[1]

    if tile_b is None:
        # Fill the MXU M dimension (128 rows) at realistic batch sizes and keep
        # >= 2 "parallel" grid steps for v7x dual-TC; for tiny batches just
        # round up to the bf16 sublane granule instead of padding to 128 rows.
        tile_b = 128 if B >= 256 else _round_up(B, 16)

    b_pad = _round_up(B, tile_b)
    x = pooled.astype(COMPUTE_DTYPE)
    if b_pad != B:
        x = jnp.pad(x, ((0, b_pad - B), (0, 0)))

    grid = (b_pad // tile_b,)

    cost = pl.CostEstimate(
        flops=2 * b_pad * H * (H + c_pad),
        transcendentals=0,
        bytes_accessed=(x.size * 2 + w1_t.size * 2 + w2_t.size * 2
                        + b1_2d.size * 4 + b2_2d.size * 4 + b_pad * c_pad * 4),
    )

    out = pl.pallas_call(
        classifier_kernel,
        out_shape=jax.ShapeDtypeStruct((b_pad, c_pad), jnp.float32),
        grid_spec=pltpu.PrefetchScalarGridSpec(
            num_scalar_prefetch=0,
            grid=grid,
            in_specs=[
                pl.BlockSpec((tile_b, H), lambda i: (i, 0)),    # pooled tile
                pl.BlockSpec((H, H), lambda i: (0, 0)),         # w1^T (resident)
                pl.BlockSpec((1, H), lambda i: (0, 0)),         # b1
                pl.BlockSpec((H, c_pad), lambda i: (0, 0)),     # w2^T (lane-padded)
                pl.BlockSpec((1, c_pad), lambda i: (0, 0)),     # b2
            ],
            out_specs=pl.BlockSpec((tile_b, c_pad), lambda i: (i, 0)),
        ),
        compiler_params=pltpu.CompilerParams(
            dimension_semantics=("parallel",),
            vmem_limit_bytes=32 * 1024 * 1024,
        ),
        cost_estimate=cost,
    )(x, w1_t, b1_2d, w2_t, b2_2d)

    # Drop the batch padding and the zero-padded class lanes.
    return out[:B, :num_classes]


def reference_forward(pooled, w1, b1, w2, b2):
    h = jnp.maximum(pooled @ w1.T + b1, 0.0)
    return h @ w2.T + b2


if __name__ == "__main__":
    # Small shapes consistent with the module (hidden_size scaled down from 1536).
    B, H, C = 8, 256, 2

    key = jax.random.PRNGKey(0)
    k_x, k_w1, k_b1, k_w2, k_b2 = jax.random.split(key, 5)

    # Deterministic synthetic "pooled_output" (stand-in for bert_model(...)[1]).
    pooled = jax.random.normal(k_x, (B, H), dtype=jnp.float32)

    # Deterministic parameter init (same shapes as nn.Linear(H, H) / nn.Linear(H, C)).
    w1 = jax.random.normal(k_w1, (H, H), dtype=jnp.float32) * 0.02
    b1 = jax.random.normal(k_b1, (H,), dtype=jnp.float32) * 0.02
    w2 = jax.random.normal(k_w2, (C, H), dtype=jnp.float32) * 0.02
    b2 = jax.random.normal(k_b2, (C,), dtype=jnp.float32) * 0.02

    # One-time prep (transpose / cast / pad) outside the jitted forward path.
    w1_t, b1_2d, w2_t, b2_2d = prepare_params(w1, b1, w2, b2)

    out = classifier_forward(pooled, w1_t, b1_2d, w2_t, b2_2d, num_classes=C)
    out = jax.block_until_ready(out)

    ref = reference_forward(pooled, w1, b1, w2, b2)
    assert out.shape == (B, C), out.shape
    # bf16 MXU operands with f32 accumulation -> loosened tolerance vs f32 reference.
    assert jnp.allclose(out, ref, atol=2e-2, rtol=2e-2), "mismatch vs reference"

    print("KERNEL_OK")
</pallas_src>

<mosaic_0001>
module attributes {stable_mosaic.version = 11 : i64} {
  func.func @classifier_kernel(%arg0: i32, %arg1: memref<16x256xbf16, #tpu.memory_space<vmem>>, %arg2: memref<256x256xbf16, #tpu.memory_space<vmem>>, %arg3: memref<1x256xf32, #tpu.memory_space<vmem>>, %arg4: memref<256x128xbf16, #tpu.memory_space<vmem>>, %arg5: memref<1x128xf32, #tpu.memory_space<vmem>>, %arg6: memref<16x128xf32, #tpu.memory_space<vmem>>) attributes {dimension_semantics = [#tpu.dimension_semantics<parallel>], iteration_bounds = array<i64: 1>, scalar_prefetch = 0 : i64, scratch_operands = 0 : i64, tpu.core_type = #tpu.core_type<tc>, window_params = [{transform_indices = @transform_0, window_bounds = array<i64: 16, 256>}, {pipeline_mode = #tpu.pipeline_mode<synchronous>, transform_indices = @transform_1, window_bounds = array<i64: 256, 256>}, {pipeline_mode = #tpu.pipeline_mode<synchronous>, transform_indices = @transform_2, window_bounds = array<i64: 1, 256>}, {pipeline_mode = #tpu.pipeline_mode<synchronous>, transform_indices = @transform_3, window_bounds = array<i64: 256, 128>}, {pipeline_mode = #tpu.pipeline_mode<synchronous>, transform_indices = @transform_4, window_bounds = array<i64: 1, 128>}, {transform_indices = @transform_5, window_bounds = array<i64: 16, 128>}]} {
    %c0 = arith.constant 0 : index
    %c0_0 = arith.constant 0 : index
    %0 = vector.load %arg1[%c0, %c0_0] : memref<16x256xbf16, #tpu.memory_space<vmem>>, vector<16x256xbf16>
    %c0_1 = arith.constant 0 : index
    %c0_2 = arith.constant 0 : index
    %1 = vector.load %arg2[%c0_1, %c0_2] : memref<256x256xbf16, #tpu.memory_space<vmem>>, vector<256x256xbf16>
    %cst = arith.constant dense<0.000000e+00> : vector<16x256xf32>
    %2 = tpu.matmul %0, %1, %cst {dimension_numbers = #tpu.dot_dimension_numbers<[1], [0], [0], [1], [0, 0, 1, 1], [], []>} : vector<16x256xbf16>, vector<256x256xbf16>, vector<16x256xf32> -> vector<16x256xf32>
    %c0_3 = arith.constant 0 : index
    %c0_4 = arith.constant 0 : index
    %3 = vector.load %arg3[%c0_3, %c0_4] : memref<1x256xf32, #tpu.memory_space<vmem>>, vector<1x256xf32>
    %4 = vector.broadcast %3 : vector<1x256xf32> to vector<16x256xf32>
    %5 = arith.addf %2, %4 : vector<16x256xf32>
    %cst_5 = arith.constant 0.000000e+00 : f32
    %6 = vector.broadcast %cst_5 : f32 to vector<16x256xf32>
    %7 = arith.maximumf %5, %6 : vector<16x256xf32>
    %8 = arith.truncf %7 : vector<16x256xf32> to vector<16x256xbf16>
    %c0_6 = arith.constant 0 : index
    %c0_7 = arith.constant 0 : index
    %9 = vector.load %arg4[%c0_6, %c0_7] : memref<256x128xbf16, #tpu.memory_space<vmem>>, vector<256x128xbf16>
    %cst_8 = arith.constant dense<0.000000e+00> : vector<16x128xf32>
    %10 = tpu.matmul %8, %9, %cst_8 {dimension_numbers = #tpu.dot_dimension_numbers<[1], [0], [0], [1], [0, 0, 1, 1], [], []>} : vector<16x256xbf16>, vector<256x128xbf16>, vector<16x128xf32> -> vector<16x128xf32>
    %c0_9 = arith.constant 0 : index
    %c0_10 = arith.constant 0 : index
    %11 = vector.load %arg5[%c0_9, %c0_10] : memref<1x128xf32, #tpu.memory_space<vmem>>, vector<1x128xf32>
    %12 = vector.broadcast %11 : vector<1x128xf32> to vector<16x128xf32>
    %13 = arith.addf %10, %12 : vector<16x128xf32>
    %c0_11 = arith.constant 0 : index
    %c0_12 = arith.constant 0 : index
    %14 = vector.load %arg6[%c0_11, %c0_12] : memref<16x128xf32, #tpu.memory_space<vmem>>, vector<16x128xf32>
    tpu.vector_store %arg6[%c0_11, %c0_12], %13 {strides = array<i32>} : memref<16x128xf32, #tpu.memory_space<vmem>>, vector<16x128xf32>,
    return
  }
  func.func @transform_0(%arg0: i32) -> (i32, i32) {
    %c0_i32 = arith.constant 0 : i32
    %c0_i32_0 = arith.constant 0 : i32
    return %arg0, %c0_i32 : i32, i32
  }
  func.func @transform_1(%arg0: i32) -> (i32, i32) {
    %c0_i32 = arith.constant 0 : i32
    %c0_i32_0 = arith.constant 0 : i32
    %c0_i32_1 = arith.constant 0 : i32
    return %c0_i32, %c0_i32_0 : i32, i32
  }
  func.func @transform_2(%arg0: i32) -> (i32, i32) {
    %c0_i32 = arith.constant 0 : i32
    %c0_i32_0 = arith.constant 0 : i32
    %c0_i32_1 = arith.constant 0 : i32
    return %c0_i32, %c0_i32_0 : i32, i32
  }
  func.func @transform_3(%arg0: i32) -> (i32, i32) {
    %c0_i32 = arith.constant 0 : i32
    %c0_i32_0 = arith.constant 0 : i32
    %c0_i32_1 = arith.constant 0 : i32
    return %c0_i32, %c0_i32_0 : i32, i32
  }
  func.func @transform_4(%arg0: i32) -> (i32, i32) {
    %c0_i32 = arith.constant 0 : i32
    %c0_i32_0 = arith.constant 0 : i32
    %c0_i32_1 = arith.constant 0 : i32
    return %c0_i32, %c0_i32_0 : i32, i32
  }
  func.func @transform_5(%arg0: i32) -> (i32, i32) {
    %c0_i32 = arith.constant 0 : i32
    %c0_i32_0 = arith.constant 0 : i32
    return %arg0, %c0_i32 : i32, i32
  }
}

</mosaic_0001>

<bundles_post_ra>
// kernel: classifier_forward.1
= control target key start
LH: loop header
LB: loop body
LE: loop exit
PB: predicated region body
PF: predicated region fallthrough
CT: control target
= control target key end

     0   :  { %10 = vsyncpa [#allocation3], 0  ;;  %s770_s0 = inlined_call_operand.vmem [shape: bf16[16,256], index: 0, kind: input, shape index: {}]   ;;  %s771_s1 = inlined_call_operand.hbm [shape: bf16[256,256], index: 1, kind: input, shape index: {}]   ;;  %s772_s2 = inlined_call_operand.vmem [shape: f32[1,256], index: 2, kind: input, shape index: {}]   ;;  %s773_s3 = inlined_call_operand.hbm [shape: bf16[256,128], index: 3, kind: input, shape index: {}]   ;;  %s774_s4 = inlined_call_operand.vmem [shape: f32[1,128], index: 4, kind: input, shape index: {}]   ;;  %s775_s5 = inlined_call_operand.vmem [shape: f32[16,128], index: 5, kind: output, shape index: {}]  }
   0x1   :  { %11 = vsyncpa [#allocation5], 0  ;;  %s692_s18 = smov [#allocation2]   ;;  %s644_s22 = scalar_lea.hbm %s771_s1, 4096 }
   0x2   :  { %s19_s19 = sshll.u32 %s692_s18, 4  ;;  %p645_p0 = scmp.ne.s32.totalorder %s771_s1, %s644_s22  ;;  %s20_s19 = int_to_ptr.vmem [resolvable:$true] %s19_s19 }
   0x3   :  { %p648_p1 = scmp.lt.u32.totalorder %s644_s22, %s771_s1 }
   0x5   :  { %p650_p2 = pnand %p648_p1, %p645_p0 }
   0x7   :  { %653 = shalt.err (!%p650_p2)
}
   0x8   :  { %s654_s27 = scalar_lea.vmem %s20_s19, 4096  ;;  %p659_p4 = scmp.lt.s32.totalorder %s20_s19, %s20_s19 }
   0x9   :  { %p655_p3 = scmp.ne.s32.totalorder %s20_s19, %s654_s27  ;;  %p660_p5 = scmp.lt.s32.totalorder %s654_s27, %s654_s27 }
   0xb   :  { %p661_p6 = por %p660_p5, %p659_p4 }
   0xd   :  { %p662_p7 = pnand %p661_p6, %p655_p3 }
   0xf   :  { %665 = shalt.err (!%p662_p7)
}
  0x10   :  { %s693_s28 = smov 128   ;;  %s694_s29 = smov 8  }
  0x11   :  { %25 = dma.hbm_to_vmem [thread:$0]  %s771_s1, 4096, %s20_s19, [#allocation3], %s693_s28, %s693_s28, %s694_s29  }
  0x12   :  { %s695_s7 = smov [#allocation4]   ;;  %s666_s11 = scalar_lea.hbm %s773_s3, 2048 }
  0x13   :  { %s33_s8 = sshll.u32 %s695_s7, 4  ;;  %p667_p8 = scmp.ne.s32.totalorder %s773_s3, %s666_s11  ;;  %s34_s8 = int_to_ptr.vmem [resolvable:$true] %s33_s8 }
  0x14   :  { %p670_p9 = scmp.lt.u32.totalorder %s666_s11, %s773_s3 }
  0x16   :  { %p672_p10 = pnand %p670_p9, %p667_p8 }
  0x18   :  { %675 = shalt.err (!%p672_p10)
}
  0x19   :  { %s676_s16 = scalar_lea.vmem %s34_s8, 2048  ;;  %p681_p12 = scmp.lt.s32.totalorder %s34_s8, %s34_s8 }
  0x1a   :  { %p677_p11 = scmp.ne.s32.totalorder %s34_s8, %s676_s16  ;;  %p682_p13 = scmp.lt.s32.totalorder %s676_s16, %s676_s16 }
  0x1c   :  { %p683_p0 = por %p682_p13, %p681_p12 }
  0x1e   :  { %p684_p1 = pnand %p683_p0, %p677_p11 }
  0x20   :  { %687 = shalt.err (!%p684_p1)
}
  0x21   :  { %s696_s1 = smov 64   ;;  %s697_s17 = smov 4  }
  0x22   :  { %39 = dma.hbm_to_vmem [thread:$0]  %s773_s3, 2048, %s34_s8, [#allocation5], %s696_s1, %s696_s1, %s697_s17  }
  0x23   :  { %688 = dma.done.wait [#allocation3], 4096  }
  0x24   :  { %689 = vsyncadd [#allocation3], 4294963200 }
  0x25   :  { %690 = dma.done.wait [#allocation5], 2048  }
  0x26   :  { %691 = vsyncadd [#allocation5], 4294965248  ;;  %v577_v0 = vld [vmem:[#allocation2 + $0x4] ss:$8 sps:$4 sm:$0xff]   ;;  %v579_v1 = vld [vmem:[#allocation2] ss:$8 sps:$4 sm:$0xff]   ;;  %v85_v50 = vlaneseq }
  0x27   :  { %265 = vmatprep.subr.bf16.mxu0 %v577_v0  ;;  %v580_v2 = vld [vmem:[#allocation2 + $0x14] ss:$8 sps:$4 sm:$0xff]   ;;  %v582_v3 = vld [vmem:[#allocation2 + $0x10] ss:$8 sps:$4 sm:$0xff]   ;;  %v583_v4 = vld [vmem:[#allocation2 + $0x24] ss:$8 sps:$4 sm:$0xff]  }
  0x28   :  { %266 = vmatpush1.bf16.msra.mxu0 %v579_v1  ;;  %v585_v5 = vld [vmem:[#allocation2 + $0x20] ss:$8 sps:$4 sm:$0xff]   ;;  %v586_v6 = vld [vmem:[#allocation2 + $0x34] ss:$8 sps:$4 sm:$0xff]   ;;  %v588_v7 = vld [vmem:[#allocation2 + $0x30] ss:$8 sps:$4 sm:$0xff]  }
  0x29   :  { %267 = vmatprep.subr.bf16.mxu0 %v580_v2  ;;  %v589_v8 = vld [vmem:[#allocation2 + $0x44] ss:$8 sps:$4 sm:$0xff]   ;;  %v591_v9 = vld [vmem:[#allocation2 + $0x40] ss:$8 sps:$4 sm:$0xff]   ;;  %v592_v10 = vld [vmem:[#allocation2 + $0x54] ss:$8 sps:$4 sm:$0xff]  }
  0x2a   :  { %v594_v11 = vld [vmem:[#allocation2 + $0x50] ss:$8 sps:$4 sm:$0xff]   ;;  %v595_v12 = vld [vmem:[#allocation2 + $0x64] ss:$8 sps:$4 sm:$0xff]   ;;  %v597_v13 = vld [vmem:[#allocation2 + $0x60] ss:$8 sps:$4 sm:$0xff]  }
  0x2b   :  { %v598_v14 = vld [vmem:[#allocation2 + $0x74] ss:$8 sps:$4 sm:$0xff]   ;;  %v627_v15 = vld [vmem:[%s770_s0 + $0x4] ss:$8 sps:$4 sm:$0xff]   ;;  %v600_v18 = vld [vmem:[#allocation2 + $0x70] ss:$8 sps:$4 sm:$0xff]  }
  0x2c   :  { %268 = vmatpush1.bf16.msra.mxu0 %v582_v3  ;;  %v628_v16 = vld [vmem:[#allocation4 + $0x40] sm:$0xff]   ;;  %297 = vmatprep.mubr.bf16.mxu0 %v627_v15  ;;  %v630_v19 = vld [vmem:[#allocation4 + $0x48] sm:$0xff]   ;;  %v632_v21 = vld [vmem:[#allocation4 + $0x50] sm:$0xff]   ;;  %v86_v51 = vshrl.u32 %v85_v50, 7 }
  0x2d   :  { %269 = vmatprep.subr.bf16.mxu0 %v583_v4  ;;  %v629_v17 = vld [vmem:[#allocation4] sm:$0xff]   ;;  %549 = vmatprep.subr.bf16.mxu1 %v628_v16  ;;  %v631_v20 = vld [vmem:[#allocation4 + $0x8] sm:$0xff]   ;;  %v633_v24 = vld [vmem:[#allocation4 + $0x10] sm:$0xff]  }
  0x2e   :  { %550 = vmatpush3.bf16.msra.mxu1 %v629_v17  ;;  %v601_v22 = vld [vmem:[#allocation2 + $0x84] ss:$8 sps:$4 sm:$0xff]   ;;  %v603_v23 = vld [vmem:[#allocation2 + $0x80] ss:$8 sps:$4 sm:$0xff]   ;;  %v634_v25 = vld [vmem:[#allocation4 + $0x58] sm:$0xff]   ;;  %v87_v52 = vsub.s32 0, %v86_v51 }
  0x2f   :  { %551 = vmatprep.subr.bf16.mxu1 %v630_v19  ;;  %v604_v26 = vld [vmem:[#allocation2 + $0x94] ss:$8 sps:$4 sm:$0xff]   ;;  %v606_v27 = vld [vmem:[#allocation2 + $0x90] ss:$8 sps:$4 sm:$0xff]   ;;  %v636_v29 = vld [vmem:[#allocation4 + $0x60] sm:$0xff]   ;;  %v91_v54 = vsub.s32 1, %v86_v51 }
  0x30   :  { %270 = vmatpush1.bf16.msra.mxu0 %v585_v5  ;;  %v635_v28 = vld [vmem:[#allocation4 + $0x18] sm:$0xff]   ;;  %v607_v30 = vld [vmem:[#allocation2 + $0xa4] ss:$8 sps:$4 sm:$0xff]   ;;  %v609_v32 = vld [vmem:[#allocation2 + $0xa0] ss:$8 sps:$4 sm:$0xff]  }
  0x31   :  { %271 = vmatprep.subr.bf16.mxu0 %v586_v6  ;;  %v637_v31 = vld [vmem:[#allocation4 + $0x20] sm:$0xff]   ;;  %v638_v33 = vld [vmem:[#allocation4 + $0x68] sm:$0xff]   ;;  %v610_v34 = vld [vmem:[#allocation2 + $0xb4] ss:$8 sps:$4 sm:$0xff]  }
  0x32   :  { %552 = vmatpush3.bf16.msra.mxu1 %v631_v20  ;;  %v612_v35 = vld [vmem:[#allocation2 + $0xb0] ss:$8 sps:$4 sm:$0xff]   ;;  %v613_v36 = vld [vmem:[#allocation2 + $0xc4] ss:$8 sps:$4 sm:$0xff]   ;;  %v615_v37 = vld [vmem:[#allocation2 + $0xc0] ss:$8 sps:$4 sm:$0xff]  }
  0x33   :  { %553 = vmatprep.subr.bf16.mxu1 %v632_v21  ;;  %v616_v38 = vld [vmem:[#allocation2 + $0xd4] ss:$8 sps:$4 sm:$0xff]   ;;  %v618_v39 = vld [vmem:[#allocation2 + $0xd0] ss:$8 sps:$4 sm:$0xff]   ;;  %v619_v40 = vld [vmem:[#allocation2 + $0xe4] ss:$8 sps:$4 sm:$0xff]  }
  0x34   :  { %272 = vmatpush1.bf16.msra.mxu0 %v588_v7  ;;  %v621_v41 = vld [vmem:[#allocation2 + $0xe0] ss:$8 sps:$4 sm:$0xff]   ;;  %v622_v42 = vld [vmem:[#allocation2 + $0xf4] ss:$8 sps:$4 sm:$0xff]   ;;  %v624_v43 = vld [vmem:[#allocation2 + $0xf0] ss:$8 sps:$4 sm:$0xff]  }
  0x35   :  { %273 = vmatprep.subr.bf16.mxu0 %v589_v8  ;;  %v625_v44 = vld [vmem:[%s770_s0] ss:$8 sps:$4 sm:$0xff]   ;;  %v640_v46 = vld [vmem:[#allocation4 + $0x70] sm:$0xff]   ;;  %v642_v48 = vld [vmem:[#allocation4 + $0x78] sm:$0xff]  }
  0x36   :  { %554 = vmatpush3.bf16.msra.mxu1 %v633_v24  ;;  %v639_v45 = vld [vmem:[#allocation4 + $0x28] sm:$0xff]   ;;  %v641_v47 = vld [vmem:[#allocation4 + $0x30] sm:$0xff]   ;;  %v643_v49 = vld [vmem:[#allocation4 + $0x38] sm:$0xff]  }
  0x37   :  { %555 = vmatprep.subr.bf16.mxu1 %v634_v25  ;;  %v83_v53 = vld [vmem:[%s772_s2] sm:$0x3] }
  0x38   :  { %274 = vmatpush1.bf16.msra.mxu0 %v591_v9  ;;  %v88_v55 = vrot.slane %v83_v53, %v87_v52  ;;  %v92_v56 = vrot.slane %v83_v53, %v91_v54  ;;  %v532_v8 = vld [vmem:[%s774_s4] ss:$0 sm:$0xff] }
  0x39   :  { %275 = vmatprep.subr.bf16.mxu0 %v592_v10 }
  0x3a   :  { %556 = vmatpush3.bf16.msra.mxu1 %v635_v28 }
  0x3b   :  { %557 = vmatprep.subr.bf16.mxu1 %v636_v29 }
  0x3c   :  { %276 = vmatpush1.bf16.msra.mxu0 %v594_v11 }
  0x3d   :  { %277 = vmatprep.subr.bf16.mxu0 %v595_v12 }
  0x3e   :  { %558 = vmatpush3.bf16.msra.mxu1 %v637_v31 }
  0x3f   :  { %559 = vmatprep.subr.bf16.mxu1 %v638_v33 }
  0x40   :  { %278 = vmatpush1.bf16.msra.mxu0 %v597_v13 }
  0x41   :  { %279 = vmatprep.subr.bf16.mxu0 %v598_v14 }
  0x42   :  { %560 = vmatpush3.bf16.msra.mxu1 %v639_v45 }
  0x43   :  { %561 = vmatprep.subr.bf16.mxu1 %v640_v46 }
  0x44   :  { %280 = vmatpush1.bf16.msra.mxu0 %v600_v18 }
  0x45   :  { %281 = vmatprep.subr.bf16.mxu0 %v601_v22 }
  0x46   :  { %562 = vmatpush3.bf16.msra.mxu1 %v641_v47 }
  0x47   :  { %563 = vmatprep.subr.bf16.mxu1 %v642_v48 }
  0x48   :  { %282 = vmatpush1.bf16.msra.mxu0 %v603_v23 }
  0x49   :  { %283 = vmatprep.subr.bf16.mxu0 %v604_v26 }
  0x4a   :  { %564 = vmatpush3.bf16.msra.mxu1 %v643_v49 }
  0x4c   :  { %284 = vmatpush1.bf16.msra.mxu0 %v606_v27 }
  0x4d   :  { %285 = vmatprep.subr.bf16.mxu0 %v607_v30 }
  0x50   :  { %286 = vmatpush1.bf16.msra.mxu0 %v609_v32 }
  0x51   :  { %287 = vmatprep.subr.bf16.mxu0 %v610_v34 }
  0x54   :  { %288 = vmatpush1.bf16.msra.mxu0 %v612_v35 }
  0x55   :  { %289 = vmatprep.subr.bf16.mxu0 %v613_v36 }
  0x58   :  { %290 = vmatpush1.bf16.msra.mxu0 %v615_v37 }
  0x59   :  { %291 = vmatprep.subr.bf16.mxu0 %v616_v38 }
  0x5c   :  { %292 = vmatpush1.bf16.msra.mxu0 %v618_v39 }
  0x5d   :  { %293 = vmatprep.subr.bf16.mxu0 %v619_v40 }
  0x60   :  { %294 = vmatpush1.bf16.msra.mxu0 %v621_v41 }
  0x61   :  { %295 = vmatprep.subr.bf16.mxu0 %v622_v42 }
  0x64   :  { %296 = vmatpush1.bf16.msra.mxu0 %v624_v43 }
  0x67   :  { %298 = vmatmul.mubr.bf16.vlgmr.msra.gmra.mrb[0].mxu0 %v625_v44 }
 0x13a   :  { %v299_v57 = vpop.f32.mrb[0].mxu0 }
 0x13b   :  { %v300_v58 = vadd.f32 %v299_v57, %v88_v55  ;;  %v301_v59 = vpop.f32.mrb[1].mxu0 }
 0x13c   :  { %v302_v60 = vadd.f32 %v301_v59, %v92_v56  ;;  %v303_v61 = vpop.f32.mrb[2].mxu0 }
 0x13d   :  { %v304_v62 = vadd.f32 %v303_v61, %v88_v55  ;;  %v305_v63 = vpop.f32.mrb[3].mxu0  ;;  %v308_v1 = vmax.f32 %v300_v58, 0.0 }
 0x13e   :  { %v306_v0 = vadd.f32 %v305_v63, %v92_v56  ;;  %v309_v3 = vmax.f32 %v302_v60, 0.0 }
 0x13f   :  { %v310_v2 = vmax.f32 %v304_v62, 0.0 }
 0x140   :  { %v311_v4 = vmax.f32 %v306_v0, 0.0 }
 0x141   :  { %v312_v5 = vpack.c.bf16 %v310_v2, %v308_v1 }
 0x142   :  { %v313_v6 = vpack.c.bf16 %v311_v4, %v309_v3 }
 0x144   :  { %481 = vmatprep.mubr.bf16.mxu1 %v313_v6 }
 0x145   :  { %482 = vmatmul.mubr.bf16.vlgmr.msra.gmra.mrb[0].mxu1 %v312_v5 }
 0x218   :  { %v565_v7 = vpop.f32.mrb[0].mxu1 }
 0x219   :  { %v566_v9 = vpop.f32.mrb[1].mxu1 }
 0x21a   :  { %v567_v10 = vadd.f32 %v566_v9, %v565_v7  ;;  %v568_v11 = vpop.f32.mrb[2].mxu1 }
 0x21b   :  { %v569_v12 = vpop.f32.mrb[3].mxu1 }
 0x21c   :  { %v484_v13 = vadd.f32 %v567_v10, %v532_v8  ;;  %v570_v14 = vadd.f32 %v569_v12, %v568_v11 }
 0x21e   :  { %490 = vst [vmem:[%s775_s5] sm:$0xff] %v484_v13  ;;  %v487_v15 = vadd.f32 %v570_v14, %v532_v8 }
 0x220   :  { %491 = vst [vmem:[%s775_s5 + $0x8] sm:$0xff] %v487_v15 }
 0x221   :  { %496 = vsyncpa [#allocation3], 1 }
 0x222   :  { %497 = vsyncpa [#allocation5], 1 }

</bundles_post_ra>
